<compile_context>
chip_gen: v6e
topology: v6e:2x2x1
jax: 0.10.0
libtpu: 0.0.40
codegen_flags: <defaults>
</compile_context>

<pallas_src>
import jax
import jax.numpy as jnp
from jax.experimental import pallas as pl
from jax.experimental.pallas import tpu as pltpu


def _channel_gate_kernel(x_ref, w1_ref, b1_ref, w2_ref, b2_ref, o_ref):
    # x_ref block: (1, C, HW) -> work on the squeezed (C, HW) slab.
    x = x_ref[0].astype(jnp.float32)                       # (C, HW)

    # Global average pool over spatial positions (lane-axis reduction).
    pooled = jnp.mean(x, axis=-1, keepdims=True)           # (C, 1)

    # fc1 (1x1 conv == dense C -> C//r) + ReLU.
    h = jnp.dot(w1_ref[...], pooled,
                preferred_element_type=jnp.float32) + b1_ref[...]   # (Cr, 1)
    h = jnp.maximum(h, 0.0)

    # fc2 (dense C//r -> C) + sigmoid gate.
    g = jnp.dot(w2_ref[...], h,
                preferred_element_type=jnp.float32) + b2_ref[...]   # (C, 1)
    g = jax.nn.sigmoid(g)

    # Channel-wise rescale of the input (broadcast gate along lanes).
    o_ref[0] = (x * g).astype(o_ref.dtype)                 # (C, HW)


def _channel_gate_one(x, w1, b1, w2, b2):
    """ChannelGate forward for a single NCHW tensor."""
    N, C, H, W = x.shape
    HW = H * W
    Cr = w1.shape[0]
    x2 = x.reshape(N, C, HW)                               # lane-dense last dim

    out = pl.pallas_call(
        _channel_gate_kernel,
        out_shape=jax.ShapeDtypeStruct((N, C, HW), x.dtype),
        grid=(N,),
        in_specs=[
            pl.BlockSpec((1, C, HW), lambda n: (n, 0, 0)),   # per-sample slab
            pl.BlockSpec((Cr, C), lambda n: (0, 0)),         # fc1 weight
            pl.BlockSpec((Cr, 1), lambda n: (0, 0)),         # fc1 bias
            pl.BlockSpec((C, Cr), lambda n: (0, 0)),         # fc2 weight
            pl.BlockSpec((C, 1), lambda n: (0, 0)),          # fc2 bias
        ],
        out_specs=pl.BlockSpec((1, C, HW), lambda n: (n, 0, 0)),
        compiler_params=pltpu.CompilerParams(
            dimension_semantics=("parallel",)),
    )(x2, w1, b1, w2, b2)
    return out.reshape(N, C, H, W)


def channel_gate(xs, w1, b1, w2, b2):
    """Pallas equivalent of ChannelGate.forward: list of tensors -> list of gated tensors."""
    return [_channel_gate_one(x, w1, b1, w2, b2) for x in xs]


if __name__ == "__main__":
    key = jax.random.PRNGKey(0)
    ks = jax.random.split(key, 6)

    # Small shapes consistent with the module: NCHW, reduction=16.
    N, C, H, W = 2, 32, 16, 16
    reduction = 16
    Cr = C // reduction  # 2

    x1 = jax.random.normal(ks[0], (N, C, H, W), dtype=jnp.float32)
    x2 = jax.random.normal(ks[1], (N, C, H, W), dtype=jnp.float32)

    # fc1: Conv2d(C, Cr, 1) -> weight (Cr, C), bias (Cr, 1)
    # fc2: Conv2d(Cr, C, 1) -> weight (C, Cr), bias (C, 1)
    w1 = jax.random.normal(ks[2], (Cr, C), dtype=jnp.float32) * 0.1
    b1 = jax.random.normal(ks[3], (Cr, 1), dtype=jnp.float32) * 0.1
    w2 = jax.random.normal(ks[4], (C, Cr), dtype=jnp.float32) * 0.1
    b2 = jax.random.normal(ks[5], (C, 1), dtype=jnp.float32) * 0.1

    outs = channel_gate([x1, x2], w1, b1, w2, b2)
    jax.block_until_ready(outs)

    # Pure-JAX reference of ChannelGate.forward (default config).
    def ref(x):
        pooled = jnp.mean(x, axis=(2, 3))                          # (N, C)
        h = jnp.maximum(pooled @ w1.T + b1[:, 0], 0.0)             # (N, Cr)
        g = jax.nn.sigmoid(h @ w2.T + b2[:, 0])                    # (N, C)
        return x * g[:, :, None, None]

    for y, x in zip(outs, [x1, x2]):
        assert y.shape == x.shape and y.dtype == x.dtype
        assert jnp.allclose(y, ref(x), atol=1e-5, rtol=1e-5)
    print("KERNEL_OK")
</pallas_src>

<mosaic_0001>
module attributes {stable_mosaic.version = 11 : i64} {
  func.func @_channel_gate_kernel(%arg0: i32, %arg1: memref<1x32x256xf32, #tpu.memory_space<vmem>>, %arg2: memref<2x32xf32, #tpu.memory_space<vmem>>, %arg3: memref<2x1xf32, #tpu.memory_space<vmem>>, %arg4: memref<32x2xf32, #tpu.memory_space<vmem>>, %arg5: memref<32x1xf32, #tpu.memory_space<vmem>>, %arg6: memref<1x32x256xf32, #tpu.memory_space<vmem>>) attributes {dimension_semantics = [#tpu.dimension_semantics<parallel>], iteration_bounds = array<i64: 2>, scalar_prefetch = 0 : i64, scratch_operands = 0 : i64, tpu.core_type = #tpu.core_type<tc>, window_params = [{transform_indices = @transform_0, window_bounds = array<i64: 1, 32, 256>}, {pipeline_mode = #tpu.pipeline_mode<synchronous>, transform_indices = @transform_1, window_bounds = array<i64: 2, 32>}, {pipeline_mode = #tpu.pipeline_mode<synchronous>, transform_indices = @transform_2, window_bounds = array<i64: 2, 1>}, {pipeline_mode = #tpu.pipeline_mode<synchronous>, transform_indices = @transform_3, window_bounds = array<i64: 32, 2>}, {pipeline_mode = #tpu.pipeline_mode<synchronous>, transform_indices = @transform_4, window_bounds = array<i64: 32, 1>}, {transform_indices = @transform_5, window_bounds = array<i64: 1, 32, 256>}]} {
    %c0 = arith.constant 0 : index
    %c0_0 = arith.constant 0 : index
    %c0_1 = arith.constant 0 : index
    %0 = vector.load %arg1[%c0, %c0_0, %c0_1] : memref<1x32x256xf32, #tpu.memory_space<vmem>>, vector<1x32x256xf32>
    %1 = vector.shape_cast %0 : vector<1x32x256xf32> to vector<32x256xf32>
    %cst = arith.constant dense<0.000000e+00> : vector<32xf32>
    %2 = vector.multi_reduction <add>, %1, %cst [1] : vector<32x256xf32> to vector<32xf32>
    %3 = vector.shape_cast %2 : vector<32xf32> to vector<32x1xf32>
    %cst_2 = arith.constant 2.560000e+02 : f32
    %4 = vector.broadcast %cst_2 : f32 to vector<32x1xf32>
    %5 = arith.divf %3, %4 : vector<32x1xf32>
    %c0_3 = arith.constant 0 : index
    %c0_4 = arith.constant 0 : index
    %6 = vector.load %arg2[%c0_3, %c0_4] : memref<2x32xf32, #tpu.memory_space<vmem>>, vector<2x32xf32>
    %cst_5 = arith.constant dense<0.000000e+00> : vector<2x1xf32>
    %7 = tpu.matmul %6, %5, %cst_5 {dimension_numbers = #tpu.dot_dimension_numbers<[1], [0], [0], [1], [0, 0, 1, 1], [], []>} : vector<2x32xf32>, vector<32x1xf32>, vector<2x1xf32> -> vector<2x1xf32>
    %c0_6 = arith.constant 0 : index
    %c0_7 = arith.constant 0 : index
    %8 = vector.load %arg3[%c0_6, %c0_7] : memref<2x1xf32, #tpu.memory_space<vmem>>, vector<2x1xf32>
    %9 = arith.addf %7, %8 : vector<2x1xf32>
    %cst_8 = arith.constant 0.000000e+00 : f32
    %10 = vector.broadcast %cst_8 : f32 to vector<2x1xf32>
    %11 = arith.maximumf %9, %10 : vector<2x1xf32>
    %c0_9 = arith.constant 0 : index
    %c0_10 = arith.constant 0 : index
    %12 = vector.load %arg4[%c0_9, %c0_10] : memref<32x2xf32, #tpu.memory_space<vmem>>, vector<32x2xf32>
    %cst_11 = arith.constant dense<0.000000e+00> : vector<32x1xf32>
    %13 = tpu.matmul %12, %11, %cst_11 {dimension_numbers = #tpu.dot_dimension_numbers<[1], [0], [0], [1], [0, 0, 1, 1], [], []>} : vector<32x2xf32>, vector<2x1xf32>, vector<32x1xf32> -> vector<32x1xf32>
    %c0_12 = arith.constant 0 : index
    %c0_13 = arith.constant 0 : index
    %14 = vector.load %arg5[%c0_12, %c0_13] : memref<32x1xf32, #tpu.memory_space<vmem>>, vector<32x1xf32>
    %15 = arith.addf %13, %14 : vector<32x1xf32>
    %16 = arith.negf %15 : vector<32x1xf32>
    %17 = math.exp %16 : vector<32x1xf32>
    %cst_14 = arith.constant 1.000000e+00 : f32
    %18 = vector.broadcast %cst_14 : f32 to vector<32x1xf32>
    %19 = arith.addf %18, %17 : vector<32x1xf32>
    %20 = arith.divf %18, %19 : vector<32x1xf32>
    %21 = vector.broadcast %20 : vector<32x1xf32> to vector<32x256xf32>
    %22 = arith.mulf %1, %21 : vector<32x256xf32>
    %c0_15 = arith.constant 0 : index
    %c0_16 = arith.constant 0 : index
    %c0_17 = arith.constant 0 : index
    %23 = vector.load %arg6[%c0_15, %c0_16, %c0_17] : memref<1x32x256xf32, #tpu.memory_space<vmem>>, vector<1x32x256xf32>
    %24 = vector.shape_cast %23 : vector<1x32x256xf32> to vector<32x256xf32>
    %25 = vector.shape_cast %22 : vector<32x256xf32> to vector<1x32x256xf32>
    tpu.vector_store %arg6[%c0_15, %c0_16, %c0_17], %25 {strides = array<i32>} : memref<1x32x256xf32, #tpu.memory_space<vmem>>, vector<1x32x256xf32>,
    return
  }
  func.func @transform_0(%arg0: i32) -> (i32, i32, i32) {
    %c0_i32 = arith.constant 0 : i32
    %c0_i32_0 = arith.constant 0 : i32
    %c0_i32_1 = arith.constant 0 : i32
    return %arg0, %c0_i32, %c0_i32_0 : i32, i32, i32
  }
  func.func @transform_1(%arg0: i32) -> (i32, i32) {
    %c0_i32 = arith.constant 0 : i32
    %c0_i32_0 = arith.constant 0 : i32
    %c0_i32_1 = arith.constant 0 : i32
    return %c0_i32, %c0_i32_0 : i32, i32
  }
  func.func @transform_2(%arg0: i32) -> (i32, i32) {
    %c0_i32 = arith.constant 0 : i32
    %c0_i32_0 = arith.constant 0 : i32
    %c0_i32_1 = arith.constant 0 : i32
    return %c0_i32, %c0_i32_0 : i32, i32
  }
  func.func @transform_3(%arg0: i32) -> (i32, i32) {
    %c0_i32 = arith.constant 0 : i32
    %c0_i32_0 = arith.constant 0 : i32
    %c0_i32_1 = arith.constant 0 : i32
    return %c0_i32, %c0_i32_0 : i32, i32
  }
  func.func @transform_4(%arg0: i32) -> (i32, i32) {
    %c0_i32 = arith.constant 0 : i32
    %c0_i32_0 = arith.constant 0 : i32
    %c0_i32_1 = arith.constant 0 : i32
    return %c0_i32, %c0_i32_0 : i32, i32
  }
  func.func @transform_5(%arg0: i32) -> (i32, i32, i32) {
    %c0_i32 = arith.constant 0 : i32
    %c0_i32_0 = arith.constant 0 : i32
    %c0_i32_1 = arith.constant 0 : i32
    return %arg0, %c0_i32, %c0_i32_0 : i32, i32, i32
  }
}

</mosaic_0001>

<bundles_post_ra>
// kernel: tpu_custom_call.1
= control target key start
LH: loop header
LB: loop body
LE: loop exit
PB: predicated region body
PF: predicated region fallthrough
CT: control target
= control target key end

     0   :  { %10 = vsyncpa [#allocation3], 0  ;;  %s1081_s0 = inlined_call_operand.hbm [shape: f32[2,32,256], index: 0, kind: input, shape index: {}]   ;;  %s1082_s1 = inlined_call_operand.vmem [shape: f32[2,32], index: 1, kind: input, shape index: {}]   ;;  %s1083_s2 = inlined_call_operand.vmem [shape: f32[2,1], index: 2, kind: input, shape index: {}]   ;;  %s1084_s3 = inlined_call_operand.vmem [shape: f32[32,2], index: 3, kind: input, shape index: {}]   ;;  %s1085_s4 = inlined_call_operand.vmem [shape: f32[32,1], index: 4, kind: input, shape index: {}]   ;;  %s1086_s5 = inlined_call_operand.hbm [shape: f32[2,32,256], index: 5, kind: output, shape index: {}]  }
   0x1   :  { %12 = vsyncpa [#allocation3 + $0x1], 0 }
   0x2   :  { %13 = vsyncpa [#allocation4], 0 }
   0x3   :  { %15 = vsyncpa [#allocation4 + $0x1], 0  ;;  %s861_s18 = smov 0   ;;  %s863_s19 = smov 0  }
   0x4   :  { %s865_s20 = smov 0   ;;  %s867_s21 = smov 0  }
   0x5 LB: > { %s882_s22 = sadd.s32 4294967295, %s820_s21   ;;  %s602_s23 = sadd.s32 4294967294, %s820_s21   ;;  %s820_s21 = sphi %s867_s21, %s1101_s21   ;;  %s816_s20 = sphi %s865_s20, %s1100_s20   ;;  %s812_s19 = sphi %s863_s19, %s1099_s19   ;;  %s808_s18 = sphi %s861_s18, %s1098_s18  }
   0x6   : > { %s886_s24 = sadd.s32 1, %s820_s21   ;;  %s28_s25 = sadd.s32 1, %s816_s20 }
   0x7   : > { %s25_s26 = ssub.s32 %s820_s21, %s886_s24  ;;  %p35_p0 = scmp.ne.s32.totalorder %s816_s20, %s812_s19 }
   0x8   : > { %p26_p1 = scmp.eq.s32.totalorder %s25_s26, 0  ;;  %p36_p2 = scmp.eq.s32.totalorder %s820_s21, 0 }
   0x9   : > { %p41_p3 = scmp.ne.s32.totalorder %s812_s19, %s808_s18  ;;  %p42_p4 = scmp.eq.s32.totalorder %s882_s22, 0 }
   0xa   : > { %s898_s27 = scalar_select %p26_p1, %s816_s20, %s28_s25  }
   0xb   : > { %p900_p5 = por %p36_p2, %p35_p0  ;;  %p904_p6 = por %p42_p4, %p41_p3 }
   0xc   : > { %p149_p7 = scmp.eq.s32.totalorder %s882_s22, 1  ;;  %p155_p8 = scmp.eq.s32.totalorder %s602_s23, 1 }
   0xd   : > { %s1090_s29 = scalar_select %p904_p6, 1, 0 }
   0xe   : > { %p669_p10 = scmp.lt.s32.totalorder %s820_s21, 2  ;;  %p911_p11 = por %p149_p7, %p35_p0 }
   0xf   : > { %p915_p12 = por %p155_p8, %p41_p3  ;;  %s187_s7 = sand.u32 1, %s816_s20  }
  0x10   : > { %s1091_s30 = scalar_select %p911_p11, 1, 0 }
  0x11   : > { %s1092_s6 = scalar_select %p915_p12, 1, 0 }
  0x12   : > { %s626_s8 = sshll.u32 %s820_s21, 10  ;;  %s605_s9 = sshll.u32 %s187_s7, 6 }
  0x13   : > { %s924_s12 = scalar_lea.hbm %s1081_s0, %s626_s8  ;;  %s191_s13 = scalar_lea.vmem [#allocation2], %s605_s9 }
  0x14   : > { %s198_s14 = sshll.u32 %s191_s13, 4  ;;  %p928_p13 = pnand %p669_p10, %p900_p5  ;;  %s932_s14 = int_to_ptr.vmem [resolvable:$true] %s198_s14 }
  0x15   : > { %s934_s16 = scalar_lea.sflag [#allocation3], %s187_s7  ;;  %s728_s17 = scalar_lea.hbm %s924_s12, 1024 }
  0x16   : > { %p729_p0 = scmp.ne.s32.totalorder %s924_s12, %s728_s17  ;;  %p730_p1 = pneg %p928_p13 }
  0x17   : > { %s733_s26 = scalar_lea.hbm %s1081_s0, 2048  ;;  %p734_p4 = scmp.lt.s32.totalorder %s924_s12, %s1081_s0 }
  0x18   : > { %p731_p2 = pnand %p730_p1, %p729_p0  ;;  %p735_p5 = scmp.lt.s32.totalorder %s733_s26, %s728_s17 }
  0x1a   : > { %p732_p3 = pneg %p731_p2  ;;  %p736_p7 = por %p735_p5, %p734_p4 }
  0x1c   : > { %p737_p8 = pnand %p736_p7, %p732_p3 }
  0x1e   : > { %740 = shalt.err (!%p737_p8)
}
  0x1f   : > { %s741_s7 = scalar_lea.vmem %s932_s14, 1024  ;;  %s822_s9 = smov [#allocation2]  }
  0x20   : > { %p742_p10 = scmp.ne.s32.totalorder %s932_s14, %s741_s7  ;;  %s746_s10 = sshll.u32 %s822_s9, 4  ;;  %s747_s10 = int_to_ptr.vmem [resolvable:$false] %s746_s10 }
  0x21   : > { %s748_s11 = scalar_lea.vmem %s747_s10, 2048  ;;  %p749_p2 = scmp.lt.s32.totalorder %s932_s14, %s747_s10 }
  0x22   : > { %p744_p9 = pnand %p742_p10, %p730_p1  ;;  %p750_p12 = scmp.lt.s32.totalorder %s748_s11, %s741_s7 }
  0x24   : > { %p745_p0 = pneg %p744_p9  ;;  %p751_p11 = por %p750_p12, %p749_p2 }
  0x26   : > { %p752_p6 = pnand %p751_p11, %p745_p0 }
  0x28   : > { %755 = shalt.err (!%p752_p6)
}
  0x29   : > { %s823_s13 = smov 256   ;;  %s824_s17 = smov 16  }
  0x2a   : > { %664 = dma.hbm_to_vmem [thread:$0]  (!%p928_p13), %s924_s12, 1024, %s932_s14, %s934_s16, %s823_s13, %s823_s13, %s824_s17  }
  0x2b   : > { %p608_p9 = scmp.ge.s32.totalorder %s820_s21, 1  ;;  %p206_p1 = scmp.lt.s32.totalorder %s820_s21, 3 }
  0x2d   : > { %p207_p3 = pnand %p608_p9, %p206_p1 }
  0x2e   : > { %s958_s23 = sand.u32 (!%p207_p3), 1, %s812_s19   ;;  %p1094_p6 = scmp.ne.s32.totalorder (!%p207_p3), %s1090_s29, 0 }
  0x2f   : > { %210 = sbr.rel (%p207_p3) target bundleno = 781 (0x30d), region = 40  ;;  %s609_s25 = sshll.u32 (!%p207_p3), %s958_s23, 6 }
  0x30   : > { %s213_s26 = scalar_lea.sflag (!%p207_p3), [#allocation3], %s958_s23  ;;  %s216_s28 = scalar_lea.vmem (!%p207_p3), [#allocation2], %s609_s25 }
  0x34   : > { %799 = dma.done.wait (%p1094_p6), %s213_s26, 1024  }
  0x35   : > { %801 = vsyncadd (%p1094_p6), %s213_s26, 4294966272  ;;  %v968_v0 = vld [vmem:[%s216_s28 + $0x30] sm:$0xff]  ;;  %v970_v1 = vld [vmem:[%s216_s28 + $0x38] sm:$0xff]  ;;  %v825_v12 = vmov 0.0   ;;  %vm826_vm0 = vmmov 0   ;;  %vm270_vm1 = vcmask 261120  }
  0x36   : > { %v972_v2 = vld [vmem:[%s216_s28 + $0x20] sm:$0xff]  ;;  %v260_v3 = vadd.f32 %v970_v1, %v968_v0  ;;  %v976_v4 = vld [vmem:[%s216_s28 + $0x28] sm:$0xff]  ;;  %v978_v5 = vld [vmem:[%s216_s28 + $0x10] sm:$0xff]  ;;  %638 = vmatprep.subr.mxu0 %v825_v12  ;;  %646 = vmatprep.mubr.msk.f32.mxu0 %vm826_vm0, %v825_v12  ;;  %vm353_vm2 = vcmask 15360   ;;  %vm366_vm3 = vcmask 1041408   ;;  %v827_v31 = vmov 0  }
  0x37   : > { %v980_v6 = vld [vmem:[%s216_s28 + $0x18] sm:$0xff]  ;;  %v984_v8 = vld [vmem:[%s216_s28] sm:$0xff]  ;;  %v986_v9 = vld [vmem:[%s216_s28 + $0x8] sm:$0xff]  ;;  %v257_v10 = vadd.f32 %v976_v4, %v972_v2  ;;  %711 = vset.pattern.permute.xlu1 %v827_v31  ;;  %710 = vset.pattern.permute.xlu0 %v827_v31  ;;  %s242_s7 = scalar_lea.vmem [#allocation5], %s609_s25  ;;  %s627_s10 = sshll.u32 %s882_s22, 10 }
  0x38   : > { %v254_v7 = vadd.f32 %v980_v6, %v978_v5  ;;  %261 = vadd.xlane.f32.xlu0 %v260_v3  ;;  %v251_v11 = vadd.f32 %v986_v9, %v984_v8  ;;  %v268_v21 = vld [vmem:[%s1082_s1] sm:$0x3]  ;;  %v346_v28 = vld [vmem:[%s1084_s3 + $0x8] sm:$0xff]  ;;  %v347_v29 = vld [vmem:[%s1084_s3 + $0x10] sm:$0xff]  ;;  %s529_s9 = sshll.u32 %s242_s7, 4  ;;  %s1036_s13 = scalar_lea.hbm %s1086_s5, %s627_s10  ;;  %s1031_s9 = int_to_ptr.vmem [resolvable:$true] %s529_s9 }
  0x39   : > { %v345_v22 = vld [vmem:[%s1084_s3] sm:$0xff]  ;;  %v348_v30 = vld [vmem:[%s1084_s3 + $0x18] sm:$0xff]  ;;  %v350_v32 = vld [vmem:[%s1085_s4 + $0x8] sm:$0xff]  ;;  %s516_s22 = scalar_lea.sflag [#allocation4], %s958_s23  ;;  %s756_s17 = scalar_lea.vmem %s1031_s9, 1024 }
  0x3a   : > { %255 = vadd.xlane.f32.xlu1 %v254_v7  ;;  %651 = vmatprep.mubr.msk.f32.mxu1 %vm353_vm2, %v345_v22  ;;  %v269_v23 = vld [vmem:[%s1083_s2] sm:$0x3]  ;;  %v352_v37 = vld [vmem:[%s1085_s4 + $0x18] sm:$0xff]  ;;  %v351_v41 = vld [vmem:[%s1085_s4 + $0x10] sm:$0xff]  ;;  %p757_p11 = scmp.ne.s32.totalorder %s1031_s9, %s756_s17  ;;  %p1095_p12 = scmp.ne.s32.totalorder %s1091_s30, 0 }
  0x3b   : > { %v349_v34 = vld [vmem:[%s1085_s4] sm:$0xff]  ;;  %s828_s26 = smov [#allocation5]  }
  0x3c   : > { %258 = vadd.xlane.f32.xlu0 %v257_v10  ;;  %p758_p13 = pnand %p757_p11, %p1095_p12  ;;  %s760_s28 = sshll.u32 %s828_s26, 4  ;;  %s761_s28 = int_to_ptr.vmem [resolvable:$false] %s760_s28 }
  0x3d   : > { %s762_s29 = scalar_lea.vmem %s761_s28, 2048  ;;  %p763_p5 = scmp.lt.s32.totalorder %s1031_s9, %s761_s28 }
  0x3e   : > { %252 = vadd.xlane.f32.xlu1 %v251_v11  ;;  %p759_p4 = pneg %p758_p13  ;;  %p764_p7 = scmp.lt.s32.totalorder %s762_s29, %s756_s17 }
  0x40   : > { %p765_p8 = por %p764_p7, %p763_p5 }
  0x42   : > { %p766_p10 = pnand %p765_p8, %p759_p4 }
  0xc1   : > { %v262_v13 = vpop.xlane.xlu0 %261 }
  0xc2   : > { %v267_v14 = vmul.f32 0.00390625, %v262_v13 }
  0xc3   : > { %v256_v15 = vpop.xlane.xlu1 %255 }
  0xc4   : > { %639 = vmatpush3.msra.mxu0 %v267_v14  ;;  %v265_v19 = vmul.f32 0.00390625, %v256_v15 }
  0xc5   : > { %v259_v16 = vpop.xlane.xlu0 %258  ;;  %640 = vmatprep.subr.mxu0 %v825_v12 }
  0xc6   : > { %v266_v17 = vmul.f32 0.00390625, %v259_v16 }
  0xc7   : > { %v253_v18 = vpop.xlane.xlu1 %252 }
  0xc8   : > { %641 = vmatpush3.msra.mxu0 %v266_v17  ;;  %v264_v20 = vmul.f32 0.00390625, %v253_v18 }
  0xc9   : > { %642 = vmatprep.subr.mxu0 %v825_v12 }
  0xca   : > { %643 = vmatpush3.msra.mxu0 %v265_v19 }
  0xcb   : > { %644 = vmatprep.subr.mxu0 %v825_v12 }
  0xcc   : > { %645 = vmatpush3.msra.mxu0 %v264_v20 }
  0xcd   : > { %647 = vmatmul.mubr.msk.f32.vlgmr.msra.gmra.mxu0 %vm270_vm1, %v268_v21 }
 0x18d   : > { %v340_v24 = vpop.f32.mrf.mxu0 }
 0x18e   : > { %v341_v25 = vadd.f32 %v340_v24, %v269_v23 }
 0x18f   : > { %v648_v26 = vpop.f32.mrf.mxu0 }
 0x190   : > { %v344_v27 = vmax.f32 %v341_v25, 0.0 }
 0x192   : > { %649 = vmatprep.subr.msk.mxu1 %vm366_vm3, %v344_v27 }
 0x193   : > { %650 = vmatpush3.msk.msra.mxu1 %vm366_vm3, %v344_v27 }
 0x194   : > { %652 = vmatmul.mubr.msk.f32.vlgmr.msra.gmra.mxu1 %vm353_vm2, %v346_v28 }
 0x195   : > { %654 = vmatprep.mubr.msk.f32.mxu1 %vm353_vm2, %v347_v29 }
 0x198   : > { %655 = vmatmul.mubr.msk.f32.gmra.mxu1 %vm353_vm2, %v348_v30 }
 0x254   : > { %v653_v33 = vpop.f32.mrf.mxu1 }
 0x255   : > { %v442_v35 = vadd.f32 %v653_v33, %v350_v32 }
 0x256   : > { %v436_v36 = vpop.f32.mrf.mxu1 }
 0x257   : > { %v618_v38 = vmul.f32 -1.442695, %v442_v35  ;;  %v437_v39 = vadd.f32 %v436_v36, %v349_v34 }
 0x258   : > { %v656_v40 = vpop.f32.mrf.mxu1 }
 0x259   : > { %712 = vpow2.f32 %v618_v38  ;;  %v617_v42 = vmul.f32 -1.442695, %v437_v39  ;;  %v452_v43 = vadd.f32 %v656_v40, %v352_v37 }
 0x25a   : > { %v446_v44 = vpop.f32.mrf.mxu1 }
 0x25b   : > { %714 = vpow2.f32 %v617_v42  ;;  %v620_v45 = vmul.f32 -1.442695, %v452_v43  ;;  %v447_v46 = vadd.f32 %v446_v44, %v351_v41 }
 0x25d   : > { %v619_v47 = vmul.f32 -1.442695, %v447_v46  ;;  %716 = vpow2.f32 %v620_v45 }
 0x25f   : > { %718 = vpow2.f32 %v619_v47 }
 0x266   : > { %v713_v48 = vpop.eup %712 }
 0x267   : > { %v468_v49 = vadd.f32 1.0, %v713_v48 }
 0x268   : > { %v715_v50 = vpop.eup %714 }
 0x269   : > { %720 = vrcp.f32 %v468_v49  ;;  %v467_v51 = vadd.f32 1.0, %v715_v50 }
 0x26a   : > { %v717_v52 = vpop.eup %716 }
 0x26b   : > { %722 = vrcp.f32 %v467_v51  ;;  %v470_v55 = vadd.f32 1.0, %v717_v52 }
 0x26c   : > { %v719_v53 = vpop.eup %718 }
 0x26d   : > { %v469_v54 = vadd.f32 1.0, %v719_v53 }
 0x26f   : > { %724 = vrcp.f32 %v469_v54 }
 0x270   : > { %726 = vrcp.f32 %v470_v55 }
 0x276   : > { %v721_v56 = vpop.eup %720 }
 0x277   : > { %486 = vperm.xlu1 %711, %v721_v56  }
 0x278   : > { %v723_v57 = vpop.eup %722 }
 0x279   : > { %481 = vperm.xlu0 %710, %v723_v57  }
 0x27c   : > { %v725_v58 = vpop.eup %724 }
 0x27d   : > { %491 = vperm.xlu1 %711, %v725_v58   ;;  %v727_v59 = vpop.eup %726 }
 0x281   : > { %496 = vperm.xlu1 %711, %v727_v59  }
 0x2f2   : > { %v487_v60 = vpop.permute.xlu1 %486 }
 0x2f3   : > { %v501_v61 = vmul.f32 %v487_v60, %v978_v5  ;;  %v502_v62 = vmul.f32 %v487_v60, %v980_v6 }
 0x2f4   : > { %v482_v63 = vpop.permute.xlu0 %481 }
 0x2f5   : > { %509 = vst [vmem:[%s242_s7 + $0x10] sm:$0xff] %v501_v61  ;;  %510 = vst [vmem:[%s242_s7 + $0x18] sm:$0xff] %v502_v62  ;;  %v499_v3 = vmul.f32 %v482_v63, %v984_v8  ;;  %v500_v7 = vmul.f32 %v482_v63, %v986_v9 }
 0x2f7   : > { %507 = vst [vmem:[%s242_s7] sm:$0xff] %v499_v3  ;;  %508 = vst [vmem:[%s242_s7 + $0x8] sm:$0xff] %v500_v7 }
 0x2f8   : > { %v492_v10 = vpop.permute.xlu1 %491 }
 0x2f9   : > { %v503_v11 = vmul.f32 %v492_v10, %v972_v2  ;;  %v504_v5 = vmul.f32 %v492_v10, %v976_v4 }
 0x2fb   : > { %511 = vst [vmem:[%s242_s7 + $0x20] sm:$0xff] %v503_v11  ;;  %512 = vst [vmem:[%s242_s7 + $0x28] sm:$0xff] %v504_v5 }
 0x2fc   : > { %v497_v6 = vpop.permute.xlu1 %496 }
 0x2fd   : > { %v505_v8 = vmul.f32 %v497_v6, %v968_v0  ;;  %v506_v2 = vmul.f32 %v497_v6, %v970_v1 }
 0x2ff   : > { %513 = vst [vmem:[%s242_s7 + $0x30] sm:$0xff] %v505_v8  ;;  %514 = vst [vmem:[%s242_s7 + $0x38] sm:$0xff] %v506_v2 }
 0x300   : > { %769 = shalt.err (!%p766_p10)
}
 0x301   : > { %s770_s12 = scalar_lea.hbm %s1036_s13, 1024  ;;  %s774_s16 = scalar_lea.hbm %s1086_s5, 2048 }
 0x302   : > { %p771_p0 = scmp.ne.s32.totalorder %s1036_s13, %s770_s12  ;;  %p775_p1 = scmp.lt.s32.totalorder %s1036_s13, %s1086_s5 }
 0x303   : > { %p776_p3 = scmp.lt.s32.totalorder %s774_s16, %s770_s12 }
 0x304   : > { %p772_p2 = pnand %p771_p0, %p1095_p12 }
 0x305   : > { %p777_p6 = por %p776_p3, %p775_p1 }
 0x306   : > { %p773_p9 = pneg %p772_p2 }
 0x308   : > { %p778_p11 = pnand %p777_p6, %p773_p9 }
 0x30a   : > { %781 = shalt.err (!%p778_p11)
}
 0x30b   : > { %s829_s10 = smov 256   ;;  %s830_s25 = smov 16  }
 0x30c   : > { %659 = dma.vmem_to_hbm [thread:$0]  (%p1095_p12), %s1031_s9, 1024, %s1036_s13, %s516_s22, %s829_s10, %s829_s10, %s830_s25  }
 0x30d PF: > { %s544_s11 = sand.u32 1, %s808_s18   ;;  %p1096_p13 = scmp.ne.s32.totalorder %s1092_s6, 0 }
 0x30e   : > { %p1097_p4 = scmp.ge.s32.totalorder %s820_s21, 2  ;;  %s545_s17 = scalar_lea.sflag [#allocation4], %s544_s11 }
 0x310   : > { %p666_p5 = pnand %p1097_p4, %p1096_p13 }
 0x312   : > { %p667_p7 = pneg %p666_p5 }
 0x314   : > { %803 = dma.done.wait (%p667_p7), %s545_s17, 1024  }
 0x315   : > { %805 = vsyncadd (%p667_p7), %s545_s17, 4294966272  ;;  %p18_p8 = scmp.ge.s32.totalorder %s886_s24, 4   ;;  %s1098_s18 = smov %s812_s19 }
 0x316   : > { %s1099_s19 = smov %s816_s20  ;;  %s1100_s20 = smov %s898_s27 }
 0x317   : > { %s1101_s21 = smov %s886_s24  ;;  %20 = sbr.rel (!%p18_p8) target bundleno = 5 (0x5), region = 85 }
 0x31c   :  { %550 = vsyncpa [#allocation3], 1 }
 0x31d   :  { %552 = vsyncpa [#allocation3 + $0x1], 1 }
 0x31e   :  { %553 = vsyncpa [#allocation4], 1 }
 0x31f   :  { %555 = vsyncpa [#allocation4 + $0x1], 1 }

</bundles_post_ra>
